<compile_context>
chip_gen: v7x
topology: tpu7x:2x2x1
jax: 0.10.0
libtpu: 0.0.40
codegen_flags: <defaults>
</compile_context>

<pallas_src>
import jax
import jax.numpy as jnp
from jax.experimental import pallas as pl
from jax.experimental.pallas import tpu as pltpu


# ----------------------------- kernels ---------------------------------------


def _make_ce_kernel_full(padding_index: int):
    """Single pass: one (row_tile, V) logits block per grid step."""

    def ce_kernel(logits_ref, labels_ref, loss_ref):
        x = logits_ref[...].astype(jnp.float32)            # (TN, V)  f32 work copy
        labels = labels_ref[...]                            # (TN, 1)  int32

        # Shift by the row max once; reuse for both the softmax denominator and
        # the one-hot target pick.
        m = jnp.max(x, axis=-1, keepdims=True)              # (TN, 1)
        xm = x - m                                           # (TN, V)
        sum_exp = jnp.sum(jnp.exp(xm), axis=-1, keepdims=True)   # (TN, 1)

        # One-hot gather of the target logit (no dynamic gather on TPU).
        col = jax.lax.broadcasted_iota(jnp.int32, (1, x.shape[-1]), 1)
        tgt_m = jnp.sum(jnp.where(col == labels, xm, 0.0),
                        axis=-1, keepdims=True)              # (TN, 1)

        # loss = logsumexp(x) - x[label] = log(sum_exp) - (x[label] - m)
        valid = labels != padding_index                      # (TN, 1) bool
        loss_ref[...] = jnp.where(valid, jnp.log(sum_exp) - tgt_m, 0.0)

    return ce_kernel


def _make_ce_kernel_split(padding_index: int, vocab_tile: int):
    """Online (flash-style) logsumexp over a split vocab axis.

    Grid = (row_blocks [parallel], vocab_blocks [arbitrary]).  Scratch
    accumulators (running max, running sum-of-exp, running target logit) are
    (row_tile, 1) f32 VMEM refs, reset at k == 0 and consumed at the last k.
    """

    def ce_kernel(logits_ref, labels_ref, loss_ref, m_sc, l_sc, t_sc):
        k = pl.program_id(1)

        @pl.when(k == 0)
        def _():
            # Large negative finite (not -inf) so exp(m_prev - m_new) is always
            # well defined even for degenerate rows.
            m_sc[...] = jnp.full_like(m_sc, -1e30)
            l_sc[...] = jnp.zeros_like(l_sc)
            t_sc[...] = jnp.zeros_like(t_sc)

        x = logits_ref[...].astype(jnp.float32)              # (TN, TV)
        labels = labels_ref[...]                              # (TN, 1)

        # Global column indices covered by this vocab block.
        col = (jax.lax.broadcasted_iota(jnp.int32, (1, vocab_tile), 1)
               + k * vocab_tile)

        m_prev = m_sc[...]
        m_new = jnp.maximum(m_prev, jnp.max(x, axis=-1, keepdims=True))
        alpha = jnp.exp(m_prev - m_new)
        l_sc[...] = alpha * l_sc[...] + jnp.sum(jnp.exp(x - m_new),
                                                axis=-1, keepdims=True)
        m_sc[...] = m_new
        # The label lands in exactly one vocab block, so a plain accumulate of the
        # raw (un-shifted) target logit is exact.
        t_sc[...] = t_sc[...] + jnp.sum(jnp.where(col == labels, x, 0.0),
                                        axis=-1, keepdims=True)

        @pl.when(k == pl.num_programs(1) - 1)
        def _():
            valid = labels != padding_index
            loss = m_sc[...] + jnp.log(l_sc[...]) - t_sc[...]
            loss_ref[...] = jnp.where(valid, loss, 0.0)

    return ce_kernel


# --------------------------- tiling helpers ----------------------------------


def _round8(n: int) -> int:
    return ((int(n) + 7) // 8) * 8


def _vmem_capacity_bytes() -> int:
    try:
        return int(pltpu.get_tpu_info().vmem_capacity_bytes)
    except Exception:
        return 64 * 1024 * 1024   # conservative fallback (v7x per-TC VMEM)


def _vmem_limit_bytes() -> int:
    # Raise the scoped-VMEM limit above the 16/32 MiB default so the bigger
    # double-buffered logits blocks compile, while leaving headroom for the
    # compiler's own scratch.  ~96 MiB on 128 MiB parts, ~48 MiB on v7x.
    return min(int(_vmem_capacity_bytes() * 0.75), 96 * 1024 * 1024)


def _choose_tiles(n_rows: int, vocab: int, in_itemsize: int):
    """Return (row_tile, vocab_tile).  vocab_tile == vocab => single-pass path."""
    budget = int(_vmem_limit_bytes() * 0.8)
    # Per-row cost of a full-vocab block: 2 pipeline buffers of the input block
    # plus ~4 f32 working copies inside the kernel (upcast, x - m, exp, select).
    per_row_full = 2 * vocab * in_itemsize + 4 * vocab * 4
    budget_rows = max(8, (budget // max(per_row_full, 1)) // 8 * 8)

    if budget_rows >= 64 or vocab % 128 != 0:
        # Full-vocab blocks keep a healthy row tile (or V can't be split cleanly).
        row_tile = max(8, min(budget_rows, 1024, _round8(n_rows)))
        return row_tile, vocab

    # Huge vocabulary: keep the row tile large and stream the vocab axis.
    row_tile = max(8, min(256, _round8(n_rows)))
    per_col = row_tile * (2 * in_itemsize + 4 * 4)
    vocab_tile = max(128, min(vocab, (budget // max(per_col, 1)) // 128 * 128))
    while vocab % vocab_tile != 0:      # both are multiples of 128 here
        vocab_tile -= 128
    return row_tile, vocab_tile


# ------------------------------ wrapper ---------------------------------------


def next_token_prediction_loss(y_predicted, y, *, padding_index: int,
                               vocab_size: int, row_tile: int | None = None,
                               vocab_tile: int | None = None):
    """Equivalent of F.cross_entropy(y_pred.view(-1, V), y.view(-1),
    ignore_index=padding_index) with 'mean' reduction.

    y_predicted: (B, T, V) float (f32 or bf16 -- bf16 is NOT upcast in HBM).
    y:           (B, T) integer labels.
    Returns a scalar float32 loss.
    """
    V = vocab_size
    logits = y_predicted.reshape(-1, V)                    # (N, V), dtype preserved
    labels = y.reshape(-1).astype(jnp.int32)               # (N,)
    N = logits.shape[0]
    itemsize = jnp.dtype(logits.dtype).itemsize

    auto_rt, auto_vt = _choose_tiles(N, V, itemsize)
    if row_tile is None:
        row_tile = auto_rt
    if vocab_tile is None:
        vocab_tile = auto_vt
    row_tile = max(8, (int(row_tile) // 8) * 8)
    vocab_tile = int(vocab_tile)
    if V % vocab_tile != 0:
        vocab_tile = V                                     # fall back to single pass

    # Pad the row count up to a multiple of row_tile with ignored rows
    # (finite zero logits + padding_index labels -> contribute exactly 0).
    N_pad = ((N + row_tile - 1) // row_tile) * row_tile
    if N_pad != N:
        logits = jnp.pad(logits, ((0, N_pad - N), (0, 0)))
        labels = jnp.pad(labels, (0, N_pad - N), constant_values=padding_index)
    labels2 = labels.reshape(-1, 1)                        # (N_pad, 1)

    num_row_blocks = N_pad // row_tile
    num_vocab_blocks = V // vocab_tile

    compiler_params_1d = pltpu.CompilerParams(
        dimension_semantics=("parallel",),                 # megacore-friendly
        vmem_limit_bytes=_vmem_limit_bytes(),
    )
    compiler_params_2d = pltpu.CompilerParams(
        dimension_semantics=("parallel", "arbitrary"),
        vmem_limit_bytes=_vmem_limit_bytes(),
    )

    if num_vocab_blocks == 1:
        per_row_loss = pl.pallas_call(
            _make_ce_kernel_full(padding_index),
            out_shape=jax.ShapeDtypeStruct((N_pad, 1), jnp.float32),
            grid_spec=pltpu.PrefetchScalarGridSpec(
                num_scalar_prefetch=0,
                grid=(num_row_blocks,),
                in_specs=[
                    pl.BlockSpec((row_tile, V), lambda i: (i, 0)),
                    pl.BlockSpec((row_tile, 1), lambda i: (i, 0)),
                ],
                out_specs=pl.BlockSpec((row_tile, 1), lambda i: (i, 0)),
            ),
            compiler_params=compiler_params_1d,
        )(logits, labels2)
    else:
        per_row_loss = pl.pallas_call(
            _make_ce_kernel_split(padding_index, vocab_tile),
            out_shape=jax.ShapeDtypeStruct((N_pad, 1), jnp.float32),
            grid_spec=pltpu.PrefetchScalarGridSpec(
                num_scalar_prefetch=0,
                grid=(num_row_blocks, num_vocab_blocks),
                in_specs=[
                    pl.BlockSpec((row_tile, vocab_tile), lambda i, k: (i, k)),
                    pl.BlockSpec((row_tile, 1), lambda i, k: (i, 0)),
                ],
                out_specs=pl.BlockSpec((row_tile, 1), lambda i, k: (i, 0)),
                scratch_shapes=[
                    pltpu.VMEM((row_tile, 1), jnp.float32),   # running max
                    pltpu.VMEM((row_tile, 1), jnp.float32),   # running sum-of-exp
                    pltpu.VMEM((row_tile, 1), jnp.float32),   # running target logit
                ],
            ),
            compiler_params=compiler_params_2d,
        )(logits, labels2)

    # Final 'mean over non-ignored targets' in the wrapper (cheap XLA reduce over
    # N_pad floats vs. the N x V kernel read).  NaN if every row is ignored,
    # matching PyTorch behaviour.
    valid_count = jnp.sum((y.reshape(-1) != padding_index).astype(jnp.float32))
    return jnp.sum(per_row_loss[:, 0]) / valid_count


# ------------------------------ reference -------------------------------------


def _reference_loss(y_predicted, y, padding_index, vocab_size):
    logits = y_predicted.reshape(-1, vocab_size).astype(jnp.float32)
    labels = y.reshape(-1)
    lse = jax.scipy.special.logsumexp(logits, axis=-1)
    safe_labels = jnp.clip(labels, 0, vocab_size - 1)
    tgt = jnp.take_along_axis(logits, safe_labels[:, None], axis=-1)[:, 0]
    valid = (labels != padding_index).astype(jnp.float32)
    return jnp.sum(jnp.where(valid > 0, lse - tgt, 0.0)) / jnp.sum(valid)


# -------------------------------- demo ----------------------------------------


if __name__ == "__main__":
    key = jax.random.PRNGKey(0)

    # --- Test 1: f32, small vocab (single-pass path) --------------------------
    B, T, V = 2, 8, 32
    padding_index = 0
    k1, k2, k3, k4, k5, k6 = jax.random.split(key, 6)
    y_predicted = jax.random.normal(k1, (B, T, V), dtype=jnp.float32)
    y = jax.random.randint(k2, (B, T), minval=1, maxval=V, dtype=jnp.int32)
    pad_mask = jax.random.bernoulli(k3, 0.25, (B, T))
    y = jnp.where(pad_mask, padding_index, y)

    loss = jax.block_until_ready(next_token_prediction_loss(
        y_predicted, y, padding_index=padding_index, vocab_size=V))
    ref = _reference_loss(y_predicted, y, padding_index, V)
    assert jnp.allclose(loss, ref, rtol=1e-5, atol=1e-5), (loss, ref)

    # --- Test 2: bf16 logits, same shapes (single-pass path) ------------------
    y_pred_bf16 = y_predicted.astype(jnp.bfloat16)
    loss_bf16 = jax.block_until_ready(next_token_prediction_loss(
        y_pred_bf16, y, padding_index=padding_index, vocab_size=V))
    ref_bf16 = _reference_loss(y_pred_bf16.astype(jnp.float32), y, padding_index, V)
    assert jnp.allclose(loss_bf16, ref_bf16, rtol=1e-4, atol=1e-4), (loss_bf16, ref_bf16)

    # --- Test 3: forced split-vocab path (online logsumexp), bf16, row padding,
    #             PyTorch-style ignore_index = -100 ----------------------------
    B2, T2, V2 = 2, 20, 512
    pad2 = -100
    yp2 = jax.random.normal(k4, (B2, T2, V2), dtype=jnp.float32) * 3.0
    y2 = jax.random.randint(k5, (B2, T2), minval=0, maxval=V2, dtype=jnp.int32)
    y2 = jnp.where(jax.random.bernoulli(k6, 0.2, (B2, T2)), pad2, y2)
    yp2_bf16 = yp2.astype(jnp.bfloat16)

    loss_split = jax.block_until_ready(next_token_prediction_loss(
        yp2_bf16, y2, padding_index=pad2, vocab_size=V2,
        row_tile=16, vocab_tile=128))
    ref_split = _reference_loss(yp2_bf16.astype(jnp.float32), y2, pad2, V2)
    assert jnp.allclose(loss_split, ref_split, rtol=1e-4, atol=1e-4), (loss_split, ref_split)

    print("KERNEL_OK")
</pallas_src>

<mosaic_0001>
module attributes {stable_mosaic.version = 11 : i64} {
  func.func @ce_kernel(%arg0: i32, %arg1: memref<16x32xf32, #tpu.memory_space<vmem>>, %arg2: memref<16x1xi32, #tpu.memory_space<vmem>>, %arg3: memref<16x1xf32, #tpu.memory_space<vmem>>) attributes {dimension_semantics = [#tpu.dimension_semantics<parallel>], iteration_bounds = array<i64: 1>, scalar_prefetch = 0 : i64, scratch_operands = 0 : i64, tpu.core_type = #tpu.core_type<tc>, window_params = [{transform_indices = @transform_0, window_bounds = array<i64: 16, 32>}, {transform_indices = @transform_1, window_bounds = array<i64: 16, 1>}, {transform_indices = @transform_2, window_bounds = array<i64: 16, 1>}]} {
    %c0 = arith.constant 0 : index
    %c0_0 = arith.constant 0 : index
    %0 = vector.load %arg1[%c0, %c0_0] : memref<16x32xf32, #tpu.memory_space<vmem>>, vector<16x32xf32>
    %c0_1 = arith.constant 0 : index
    %c0_2 = arith.constant 0 : index
    %1 = vector.load %arg2[%c0_1, %c0_2] : memref<16x1xi32, #tpu.memory_space<vmem>>, vector<16x1xi32>
    %cst = arith.constant dense<0xFF800000> : vector<16xf32>
    %2 = vector.multi_reduction <maximumf>, %0, %cst [1] : vector<16x32xf32> to vector<16xf32>
    %3 = vector.shape_cast %2 : vector<16xf32> to vector<16x1xf32>
    %4 = vector.broadcast %3 : vector<16x1xf32> to vector<16x32xf32>
    %5 = arith.subf %0, %4 : vector<16x32xf32>
    %6 = math.exp %5 : vector<16x32xf32>
    %cst_3 = arith.constant dense<0.000000e+00> : vector<16xf32>
    %7 = vector.multi_reduction <add>, %6, %cst_3 [1] : vector<16x32xf32> to vector<16xf32>
    %8 = vector.shape_cast %7 : vector<16xf32> to vector<16x1xf32>
    %9 = tpu.iota {dimensions = array<i32: 1>} : vector<1x32xi32>
    %10 = vector.broadcast %9 : vector<1x32xi32> to vector<16x32xi32>
    %11 = vector.broadcast %1 : vector<16x1xi32> to vector<16x32xi32>
    %12 = arith.cmpi eq, %10, %11 : vector<16x32xi32>
    %cst_4 = arith.constant 0.000000e+00 : f32
    %13 = vector.broadcast %cst_4 : f32 to vector<16x32xf32>
    %14 = arith.select %12, %5, %13 : vector<16x32xi1>, vector<16x32xf32>
    %cst_5 = arith.constant dense<0.000000e+00> : vector<16xf32>
    %15 = vector.multi_reduction <add>, %14, %cst_5 [1] : vector<16x32xf32> to vector<16xf32>
    %16 = vector.shape_cast %15 : vector<16xf32> to vector<16x1xf32>
    %c0_i32 = arith.constant 0 : i32
    %17 = vector.broadcast %c0_i32 : i32 to vector<16x1xi32>
    %18 = arith.cmpi ne, %1, %17 : vector<16x1xi32>
    %19 = math.log %8 : vector<16x1xf32>
    %20 = arith.subf %19, %16 : vector<16x1xf32>
    %cst_6 = arith.constant 0.000000e+00 : f32
    %21 = vector.broadcast %cst_6 : f32 to vector<16x1xf32>
    %22 = arith.select %18, %20, %21 : vector<16x1xi1>, vector<16x1xf32>
    %c0_7 = arith.constant 0 : index
    %c0_8 = arith.constant 0 : index
    %23 = vector.load %arg3[%c0_7, %c0_8] : memref<16x1xf32, #tpu.memory_space<vmem>>, vector<16x1xf32>
    tpu.vector_store %arg3[%c0_7, %c0_8], %22 {strides = array<i32>} : memref<16x1xf32, #tpu.memory_space<vmem>>, vector<16x1xf32>,
    return
  }
  func.func @transform_0(%arg0: i32) -> (i32, i32) {
    %c0_i32 = arith.constant 0 : i32
    %c0_i32_0 = arith.constant 0 : i32
    return %arg0, %c0_i32 : i32, i32
  }
  func.func @transform_1(%arg0: i32) -> (i32, i32) {
    %c0_i32 = arith.constant 0 : i32
    %c0_i32_0 = arith.constant 0 : i32
    return %arg0, %c0_i32 : i32, i32
  }
  func.func @transform_2(%arg0: i32) -> (i32, i32) {
    %c0_i32 = arith.constant 0 : i32
    %c0_i32_0 = arith.constant 0 : i32
    return %arg0, %c0_i32 : i32, i32
  }
}

</mosaic_0001>

<bundles_post_ra>
// kernel: tpu_custom_call.1
= control target key start
LH: loop header
LB: loop body
LE: loop exit
PB: predicated region body
PF: predicated region fallthrough
CT: control target
= control target key end

     0   :  { %vm15_vm0 = vcmask 261120   ;;  %v80_v2 = vmov 0   ;;  %v34_v12 = vlaneseq  ;;  %vm62_vm4 = vcmask 7168   ;;  %s120_s0 = inlined_call_operand.vmem [shape: f32[16,32], index: 0, kind: input, shape index: {}]   ;;  %s121_s1 = inlined_call_operand.vmem [shape: s32[16,1], index: 1, kind: input, shape index: {}]   ;;  %s122_s2 = inlined_call_operand.vmem [shape: f32[16,1], index: 2, kind: output, shape index: {}]  }
   0x1   :  { %v11_v0 = vld [vmem:[%s120_s0] sm:$0xff]  ;;  %v12_v1 = vld [vmem:[%s120_s0 + $0x8] sm:$0xff]  ;;  %70 = vset.pattern.permute.xlu1 %v80_v2  ;;  %71 = vset.pattern.permute.xlu0 %v80_v2 }
   0x2   :  { %v13_v3 = vld [vmem:[%s121_s1] sm:$0xff]  ;;  %v16_v4 = vsel %vm15_vm0, %v11_v0, -inf  ;;  %v14_v5 = vld [vmem:[%s121_s1 + $0x8] sm:$0xff]  ;;  %v19_v6 = vsel %vm15_vm0, %v12_v1, -inf  ;;  %v35_v15 = vand.u32 127, %v34_v12 }
   0x3   :  { %37 = vperm.xlu1 %70, %v13_v3   ;;  %17 = vmax.xlane.f32.xlu0 %v16_v4  ;;  %vm52_vm3 = vcmp.ne.s32.totalorder %v13_v3, 0  ;;  %vm53_vm5 = vcmp.ne.s32.totalorder %v14_v5, 0 }
   0x7   :  { %40 = vperm.xlu1 %70, %v14_v5   ;;  %20 = vmax.xlane.f32.xlu0 %v19_v6 }
  0x82   :  { %v38_v14 = vpop.permute.xlu1 %37 }
  0x83   :  { %vm42_vm1 = vcmp.eq.s32.totalorder %v35_v15, %v38_v14 }
  0x86   :  { %v41_v17 = vpop.permute.xlu1 %40 }
  0x87   :  { %vm43_vm2 = vcmp.eq.s32.totalorder %v35_v15, %v41_v17 }
  0x90   :  { %v18_v7 = vpop.xlane.xlu0 %17 }
  0x91   :  { %v22_v8 = vsub.f32 %v11_v0, %v18_v7 }
  0x93   :  { %v24_v9 = vmul.f32 1.442695, %v22_v8  ;;  %v44_v19 = vsel %vm42_vm1, %v22_v8, 0.0 }
  0x94   :  { %v21_v10 = vpop.xlane.xlu0 %20  ;;  %v46_v21 = vsel %vm15_vm0, %v44_v19, 0.0 }
  0x95   :  { %72 = vpow2.f32 %v24_v9  ;;  %v23_v11 = vsub.f32 %v12_v1, %v21_v10 }
  0x97   :  { %v26_v13 = vmul.f32 1.442695, %v23_v11  ;;  %v45_v23 = vsel %vm43_vm2, %v23_v11, 0.0 }
  0x98   :  { %v49_v24 = vsel %vm15_vm0, %v45_v23, 0.0 }
  0x99   :  { %74 = vpow2.f32 %v26_v13 }
  0x9f   :  { %v73_v16 = vpop.eup %72 }
  0xa0   :  { %v28_v18 = vsel %vm15_vm0, %v73_v16, 0.0 }
  0xa1   :  { %29 = vadd.xlane.f32.xlu0 %v28_v18 }
  0xa3   :  { %v75_v20 = vpop.eup %74 }
  0xa4   :  { %v31_v22 = vsel %vm15_vm0, %v75_v20, 0.0 }
  0xa5   :  { %47 = vadd.xlane.f32.xlu0 %v46_v21  ;;  %32 = vadd.xlane.f32.xlu1 %v31_v22 }
  0xa9   :  { %50 = vadd.xlane.f32.xlu0 %v49_v24 }
 0x12e   :  { %v30_v25 = vpop.xlane.xlu0 %29 }
 0x12f   :  { %76 = vlog2.f32 %v30_v25 }
 0x132   :  { %v33_v26 = vpop.xlane.xlu1 %32  ;;  %v48_v28 = vpop.xlane.xlu0 %47 }
 0x133   :  { %78 = vlog2.f32 %v33_v26 }
 0x136   :  { %v51_v34 = vpop.xlane.xlu0 %50 }
 0x139   :  { %v77_v27 = vpop.eup %76 }
 0x13a   :  { %v55_v29 = vmul.f32 0.6931472, %v77_v27 }
 0x13c   :  { %v58_v30 = vsub.f32 %v55_v29, %v48_v28 }
 0x13d   :  { %v79_v31 = vpop.eup %78 }
 0x13e   :  { %v60_v32 = vsel %vm52_vm3, %v58_v30, 0.0  ;;  %v57_v33 = vmul.f32 0.6931472, %v79_v31 }
 0x13f   :  { %63 = vst.msk [vmem:[%s122_s2] sm:$0xff] %vm62_vm4, %v60_v32 }
 0x140   :  { %v59_v35 = vsub.f32 %v57_v33, %v51_v34 }
 0x142   :  { %v61_v36 = vsel %vm53_vm5, %v59_v35, 0.0 }
 0x143   :  { %64 = vst.msk [vmem:[%s122_s2 + $0x8] sm:$0xff] %vm62_vm4, %v61_v36 }

</bundles_post_ra>
